<compile_context>
chip_gen: v7x
topology: tpu7x:2x2x1
jax: 0.10.0
libtpu: 0.0.40
codegen_flags: <defaults>
</compile_context>

<pallas_src>
from functools import partial

import jax
import jax.numpy as jnp
from jax.experimental import pallas as pl
from jax.experimental.pallas import tpu as pltpu


# --------------------------------------------------------------------------
# helpers straight from the PyTorch module (pure Python, no tensors)
# --------------------------------------------------------------------------
def make_divisible(v, divisor=8, min_value=None):
    min_value = min_value or divisor
    new_v = max(min_value, int(v + divisor / 2) // divisor * divisor)
    if new_v < 0.9 * v:
        new_v += divisor
    return new_v


def _pick_tile(a, target=1024):
    """Largest multiple of 128 that divides `a` and is <= target (or full extent)."""
    if a % 128 != 0:
        return a  # full-extent block (always a legal block shape)
    t = min(max((target // 128) * 128, 128), a)
    while a % t != 0:
        t -= 128
    return t


# --------------------------------------------------------------------------
# fused Pallas kernel: (folded) normalize + head + decode + keep mask
# --------------------------------------------------------------------------
def _fused_kernel(x_ref, wt_ref, b_ref, inv_gn_ref, *out_refs,
                  nc, img_w, img_h, conf_thres, with_normalized):
    # x_ref:      (1, C, TA)  bf16 channel-major image tile (A on lanes), raw 0..255
    # wt_ref:     (no, C)     f32 head weights (1/255 already folded in, tiny tile)
    # b_ref:      (no, 1)     f32 head bias
    # inv_gn_ref: (N, 6)      f32 per-image 1/gn in SMEM
    # outputs:    (1, 6, TA)  xyxy / xywh (/ xyxyn / xywhn) and (1, 1, TA) keep
    if with_normalized:
        xyxy_ref, xywh_ref, xyxyn_ref, xywhn_ref, keep_ref = out_refs
    else:
        xyxy_ref, xywh_ref, keep_ref = out_refs

    img_n = pl.program_id(0)

    # raw pixel values; x/255 is folded into wt_ref host-side (head is linear),
    # so no full-width normalization multiply is needed here.
    x = x_ref[0].astype(jnp.float32)                           # (C, TA)

    # ---- 1x1-conv detection head on the VPU (K=3, no=8 is too small for MXU) ----
    w_mat = wt_ref[...]                                        # (no, C)
    z = b_ref[...]                                             # (no, 1), broadcasts
    c_in = x.shape[0]
    for c in range(c_in):                                      # 3 broadcast outer-FMAs
        z = z + w_mat[:, c:c + 1] * x[c:c + 1, :]              # (no, TA)
    y = jax.nn.sigmoid(z)                                      # EUP

    # ---- decode (xywh -> xyxy, conf = obj * max(cls), cls = argmax) ----
    cx = y[0:1, :] * img_w
    cy = y[1:2, :] * img_h
    bw = y[2:3, :] * img_w
    bh = y[3:4, :] * img_h
    obj = y[4:5, :]

    best = y[5:6, :]
    best_idx = jnp.zeros_like(best)
    # nc is small & static here; for nc~80 replace with an XLU sublane max/argmax.
    for c in range(1, nc):
        p = y[5 + c:6 + c, :]
        upd = p > best
        best = jnp.where(upd, p, best)
        best_idx = jnp.where(upd, float(c), best_idx)
    conf = obj * best
    cls = best_idx

    hw = bw * 0.5
    hh = bh * 0.5
    x1 = cx - hw
    y1 = cy - hh
    x2 = cx + hw
    y2 = cy + hh

    # ---- lane-dense row-by-row stores (no jnp.stack temporaries) ----
    xyxy_rows = (x1, y1, x2, y2, conf, cls)
    xywh_rows = (cx, cy, bw, bh, conf, cls)
    for i in range(6):
        xyxy_ref[0, i:i + 1, :] = xyxy_rows[i]
        xywh_ref[0, i:i + 1, :] = xywh_rows[i]
    if with_normalized:
        inv_g = [inv_gn_ref[img_n, i] for i in range(6)]       # hoisted SMEM scalars
        for i in range(6):
            xyxyn_ref[0, i:i + 1, :] = xyxy_rows[i] * inv_g[i]
            xywhn_ref[0, i:i + 1, :] = xywh_rows[i] * inv_g[i]

    # confidence-threshold candidates for NMS, emitted here (avoids an extra HBM read)
    keep_ref[0, 0:1, :] = (conf > conf_thres).astype(jnp.float32)


# --------------------------------------------------------------------------
# pallas_call wrapper
# --------------------------------------------------------------------------
def fused_forward(x_cm, wt, b_col, inv_gn, *, nc, img_w, img_h, conf_thres,
                  with_normalized=True, tile_a=1024):
    """x_cm: (N, C, A) bf16 channel-major images (raw 0..255 values).
    wt must already contain the folded 1/255 normalization.
    Returns channel-major results."""
    N, C, A = x_cm.shape
    no = 5 + nc
    assert wt.shape == (no, C) and b_col.shape == (no, 1)

    ta = _pick_tile(A, tile_a)
    grid = (N, A // ta)

    box_spec = pl.BlockSpec((1, 6, ta), lambda n, a: (n, 0, a))
    keep_spec = pl.BlockSpec((1, 1, ta), lambda n, a: (n, 0, a))
    box_shape = jax.ShapeDtypeStruct((N, 6, A), jnp.float32)
    keep_shape = jax.ShapeDtypeStruct((N, 1, A), jnp.float32)

    if with_normalized:
        out_shape = (box_shape,) * 4 + (keep_shape,)
        out_specs = (box_spec,) * 4 + (keep_spec,)
    else:
        out_shape = (box_shape,) * 2 + (keep_shape,)
        out_specs = (box_spec,) * 2 + (keep_spec,)

    kernel = partial(_fused_kernel, nc=nc, img_w=float(img_w), img_h=float(img_h),
                     conf_thres=float(conf_thres), with_normalized=with_normalized)

    return pl.pallas_call(
        kernel,
        out_shape=out_shape,
        grid=grid,
        in_specs=[
            pl.BlockSpec((1, C, ta), lambda n, a: (n, 0, a)),          # images
            pl.BlockSpec((no, C), lambda n, a: (0, 0)),                # head weights
            pl.BlockSpec((no, 1), lambda n, a: (0, 0)),                # head bias
            pl.BlockSpec(memory_space=pltpu.MemorySpace.SMEM),         # 1/gn scalars
        ],
        out_specs=out_specs,
        compiler_params=pltpu.CompilerParams(
            dimension_semantics=("parallel", "parallel"),
            vmem_limit_bytes=32 * 1024 * 1024,
        ),
    )(x_cm, wt, b_col, inv_gn)


# --------------------------------------------------------------------------
# autoShape equivalent
# --------------------------------------------------------------------------
class AutoShapePallas:
    conf = 0.25
    iou = 0.45
    classes = None

    def __init__(self, nc=3, size=16, stride=8, key=None, with_normalized=True):
        if key is None:
            key = jax.random.PRNGKey(0)
        self.nc = nc
        self.no = 5 + nc
        self.size = size
        self.stride = stride
        self.with_normalized = with_normalized
        # deterministic synthetic "model" parameters (stand-in for self.model),
        # stored in kernel-friendly layouts: (no, C) and (no, 1)
        k_w, k_b = jax.random.split(key)
        w = jax.random.normal(k_w, (3, self.no), dtype=jnp.float32) * 0.5
        b = jax.random.normal(k_b, (1, self.no), dtype=jnp.float32) * 0.1
        self.wt = jnp.transpose(w)                       # (no, 3)  original weights
        self.wt_k = self.wt * (1.0 / 255.0)              # (no, 3)  1/255 folded in
        self.b_col = jnp.transpose(b)                    # (no, 1)
        self.names = [f"class{i}" for i in range(nc)]

    def forward(self, imgs):
        # imgs: list of HWC uint8 arrays (all same size, already network-sized)
        n = len(imgs)
        shape0 = [tuple(int(v) for v in im.shape[:2]) for im in imgs]
        g = self.size / max(shape0[0])
        shape1 = [make_divisible(int(y * g), self.stride) for y in shape0[0]]
        h1, w1 = shape1
        # TODO(synk): letterbox resize skipped — inputs assumed equal to shape1.

        x = jnp.stack([jnp.asarray(im)[:, :, :3] for im in imgs], 0)   # (N,H,W,3) uint8
        N, H, W, C = x.shape
        A = H * W
        # Single cheap uint8 transpose to channel-major; bf16 transport is exact
        # for 0..255 and halves the kernel's input HBM read vs float32.
        x_cm = jnp.transpose(x, (0, 3, 1, 2)).reshape(N, C, A).astype(jnp.bfloat16)

        # per-image 1/gn (Detections normalization gains), tiny SMEM table
        inv_gn = jnp.asarray(
            [[1.0 / s[1], 1.0 / s[0], 1.0 / s[1], 1.0 / s[0], 1.0, 1.0] for s in shape0],
            dtype=jnp.float32)                                          # (N, 6)

        outs = fused_forward(x_cm, self.wt_k, self.b_col, inv_gn,
                             nc=self.nc, img_w=w1, img_h=h1,
                             conf_thres=self.conf,
                             with_normalized=self.with_normalized)
        if self.with_normalized:
            xyxy, xywh, xyxyn, xywhn, keep_f = outs
        else:
            xyxy, xywh, keep_f = outs
            xyxyn = xywhn = None

        # Results are channel-major (N, 6, A): axis 1 holds
        # [x1,y1,x2,y2,conf,cls] (xyxy*) / [cx,cy,w,h,conf,cls] (xywh*).
        keep = keep_f[:, 0, :] > 0.5      # confidence candidates (NMS threshold)

        return {
            "xyxy": xyxy, "xywh": xywh, "xyxyn": xyxyn, "xywhn": xywhn,
            "keep": keep, "n": n, "shape": (N, C, H, W), "names": self.names,
        }


# --------------------------------------------------------------------------
# pure-JAX reference (boxes + conf only; cls excluded to avoid tie ambiguity)
# --------------------------------------------------------------------------
def _reference_boxes(imgs_u8, wt, b_col, img_w, img_h):
    x = imgs_u8.astype(jnp.float32) / 255.0                       # (N,H,W,3)
    N, H, W, C = x.shape
    x_cm = jnp.transpose(x, (0, 3, 1, 2)).reshape(N, C, H * W)    # (N,C,A)
    z = jnp.einsum("oc,nca->noa", wt, x_cm) + b_col[None]         # (N,no,A)
    y = jax.nn.sigmoid(z)
    cx = y[:, 0] * img_w
    cy = y[:, 1] * img_h
    bw = y[:, 2] * img_w
    bh = y[:, 3] * img_h
    obj = y[:, 4]
    best = jnp.max(y[:, 5:], axis=1)
    conf = obj * best
    x1 = cx - bw * 0.5
    y1 = cy - bh * 0.5
    x2 = cx + bw * 0.5
    y2 = cy + bh * 0.5
    return jnp.stack([x1, y1, x2, y2, conf], axis=1)              # (N,5,A)


# --------------------------------------------------------------------------
if __name__ == "__main__":
    key = jax.random.PRNGKey(0)
    k_img, k_model = jax.random.split(key)
    # two deterministic 16x16 RGB uint8 "images"
    imgs_arr = jax.random.randint(k_img, (2, 16, 16, 3), 0, 256,
                                  dtype=jnp.int32).astype(jnp.uint8)
    imgs = [imgs_arr[i] for i in range(2)]

    model = AutoShapePallas(nc=3, size=16, stride=8, key=k_model)
    out = model.forward(imgs)
    jax.block_until_ready(out["xyxy"])
    jax.block_until_ready(out["xywhn"])
    jax.block_until_ready(out["keep"])

    assert out["xyxy"].shape == (2, 6, 256)     # (N, [x1,y1,x2,y2,conf,cls], A)
    assert out["xywhn"].shape == (2, 6, 256)
    assert out["keep"].shape == (2, 256)

    # correctness check against a pure-JAX reference (boxes + conf)
    ref = _reference_boxes(imgs_arr, model.wt, model.b_col, 16, 16)
    got = out["xyxy"][:, :5, :]
    assert jnp.allclose(got, ref, atol=5e-3, rtol=5e-3), \
        float(jnp.max(jnp.abs(got - ref)))

    print("KERNEL_OK")
</pallas_src>

<mosaic_0001>
module attributes {stable_mosaic.version = 11 : i64} {
  func.func @_fused_kernel(%arg0: i32, %arg1: i32, %arg2: memref<1x3x256xbf16, #tpu.memory_space<vmem>>, %arg3: memref<8x3xf32, #tpu.memory_space<vmem>>, %arg4: memref<8x1xf32, #tpu.memory_space<vmem>>, %arg5: memref<2x6xf32, #tpu.memory_space<smem>>, %arg6: memref<1x6x256xf32, #tpu.memory_space<vmem>>, %arg7: memref<1x6x256xf32, #tpu.memory_space<vmem>>, %arg8: memref<1x6x256xf32, #tpu.memory_space<vmem>>, %arg9: memref<1x6x256xf32, #tpu.memory_space<vmem>>, %arg10: memref<1x1x256xf32, #tpu.memory_space<vmem>>) attributes {dimension_semantics = [#tpu.dimension_semantics<parallel>, #tpu.dimension_semantics<parallel>], iteration_bounds = array<i64: 2, 1>, scalar_prefetch = 0 : i64, scratch_operands = 0 : i64, tpu.core_type = #tpu.core_type<tc>, window_params = [{transform_indices = @transform_0, window_bounds = array<i64: 1, 3, 256>}, {pipeline_mode = #tpu.pipeline_mode<synchronous>, transform_indices = @transform_1, window_bounds = array<i64: 8, 3>}, {pipeline_mode = #tpu.pipeline_mode<synchronous>, transform_indices = @transform_2, window_bounds = array<i64: 8, 1>}, {transform_indices = @transform_3, window_bounds = array<i64: 2, 6>}, {transform_indices = @transform_4, window_bounds = array<i64: 1, 6, 256>}, {transform_indices = @transform_5, window_bounds = array<i64: 1, 6, 256>}, {transform_indices = @transform_6, window_bounds = array<i64: 1, 6, 256>}, {transform_indices = @transform_7, window_bounds = array<i64: 1, 6, 256>}, {transform_indices = @transform_8, window_bounds = array<i64: 1, 1, 256>}]} {
    %c0 = arith.constant 0 : index
    %c0_0 = arith.constant 0 : index
    %c0_1 = arith.constant 0 : index
    %0 = vector.load %arg2[%c0, %c0_0, %c0_1] : memref<1x3x256xbf16, #tpu.memory_space<vmem>>, vector<1x3x256xbf16>
    %1 = vector.shape_cast %0 : vector<1x3x256xbf16> to vector<3x256xbf16>
    %2 = arith.extf %1 : vector<3x256xbf16> to vector<3x256xf32>
    %c0_2 = arith.constant 0 : index
    %c0_3 = arith.constant 0 : index
    %3 = vector.load %arg3[%c0_2, %c0_3] : memref<8x3xf32, #tpu.memory_space<vmem>>, vector<8x3xf32>
    %c0_4 = arith.constant 0 : index
    %c0_5 = arith.constant 0 : index
    %4 = vector.load %arg4[%c0_4, %c0_5] : memref<8x1xf32, #tpu.memory_space<vmem>>, vector<8x1xf32>
    %5 = vector.extract_strided_slice %3 {offsets = [0, 0], sizes = [8, 1], strides = [1, 1]} : vector<8x3xf32> to vector<8x1xf32>
    %6 = vector.extract_strided_slice %2 {offsets = [0, 0], sizes = [1, 256], strides = [1, 1]} : vector<3x256xf32> to vector<1x256xf32>
    %7 = vector.broadcast %5 : vector<8x1xf32> to vector<8x256xf32>
    %8 = vector.broadcast %6 : vector<1x256xf32> to vector<8x256xf32>
    %9 = arith.mulf %7, %8 : vector<8x256xf32>
    %10 = vector.broadcast %4 : vector<8x1xf32> to vector<8x256xf32>
    %11 = arith.addf %10, %9 : vector<8x256xf32>
    %12 = vector.extract_strided_slice %3 {offsets = [0, 1], sizes = [8, 1], strides = [1, 1]} : vector<8x3xf32> to vector<8x1xf32>
    %13 = vector.extract_strided_slice %2 {offsets = [1, 0], sizes = [1, 256], strides = [1, 1]} : vector<3x256xf32> to vector<1x256xf32>
    %14 = vector.broadcast %12 : vector<8x1xf32> to vector<8x256xf32>
    %15 = vector.broadcast %13 : vector<1x256xf32> to vector<8x256xf32>
    %16 = arith.mulf %14, %15 : vector<8x256xf32>
    %17 = arith.addf %11, %16 : vector<8x256xf32>
    %18 = vector.extract_strided_slice %3 {offsets = [0, 2], sizes = [8, 1], strides = [1, 1]} : vector<8x3xf32> to vector<8x1xf32>
    %19 = vector.extract_strided_slice %2 {offsets = [2, 0], sizes = [1, 256], strides = [1, 1]} : vector<3x256xf32> to vector<1x256xf32>
    %20 = vector.broadcast %18 : vector<8x1xf32> to vector<8x256xf32>
    %21 = vector.broadcast %19 : vector<1x256xf32> to vector<8x256xf32>
    %22 = arith.mulf %20, %21 : vector<8x256xf32>
    %23 = arith.addf %17, %22 : vector<8x256xf32>
    %24 = arith.negf %23 : vector<8x256xf32>
    %25 = math.exp %24 : vector<8x256xf32>
    %cst = arith.constant 1.000000e+00 : f32
    %26 = vector.broadcast %cst : f32 to vector<8x256xf32>
    %27 = arith.addf %26, %25 : vector<8x256xf32>
    %28 = arith.divf %26, %27 : vector<8x256xf32>
    %29 = vector.extract_strided_slice %28 {offsets = [0, 0], sizes = [1, 256], strides = [1, 1]} : vector<8x256xf32> to vector<1x256xf32>
    %cst_6 = arith.constant 1.600000e+01 : f32
    %30 = vector.broadcast %cst_6 : f32 to vector<1x256xf32>
    %31 = arith.mulf %29, %30 : vector<1x256xf32>
    %32 = vector.extract_strided_slice %28 {offsets = [1, 0], sizes = [1, 256], strides = [1, 1]} : vector<8x256xf32> to vector<1x256xf32>
    %cst_7 = arith.constant 1.600000e+01 : f32
    %33 = vector.broadcast %cst_7 : f32 to vector<1x256xf32>
    %34 = arith.mulf %32, %33 : vector<1x256xf32>
    %35 = vector.extract_strided_slice %28 {offsets = [2, 0], sizes = [1, 256], strides = [1, 1]} : vector<8x256xf32> to vector<1x256xf32>
    %cst_8 = arith.constant 1.600000e+01 : f32
    %36 = vector.broadcast %cst_8 : f32 to vector<1x256xf32>
    %37 = arith.mulf %35, %36 : vector<1x256xf32>
    %38 = vector.extract_strided_slice %28 {offsets = [3, 0], sizes = [1, 256], strides = [1, 1]} : vector<8x256xf32> to vector<1x256xf32>
    %cst_9 = arith.constant 1.600000e+01 : f32
    %39 = vector.broadcast %cst_9 : f32 to vector<1x256xf32>
    %40 = arith.mulf %38, %39 : vector<1x256xf32>
    %41 = vector.extract_strided_slice %28 {offsets = [4, 0], sizes = [1, 256], strides = [1, 1]} : vector<8x256xf32> to vector<1x256xf32>
    %42 = vector.extract_strided_slice %28 {offsets = [5, 0], sizes = [1, 256], strides = [1, 1]} : vector<8x256xf32> to vector<1x256xf32>
    %cst_10 = arith.constant 0.000000e+00 : f32
    %43 = vector.broadcast %cst_10 : f32 to vector<1x256xf32>
    %44 = vector.extract_strided_slice %28 {offsets = [6, 0], sizes = [1, 256], strides = [1, 1]} : vector<8x256xf32> to vector<1x256xf32>
    %45 = arith.cmpf ogt, %44, %42 : vector<1x256xf32>
    %46 = arith.select %45, %44, %42 : vector<1x256xi1>, vector<1x256xf32>
    %cst_11 = arith.constant 1.000000e+00 : f32
    %47 = vector.broadcast %cst_11 : f32 to vector<1x256xf32>
    %48 = arith.select %45, %47, %43 : vector<1x256xi1>, vector<1x256xf32>
    %49 = vector.extract_strided_slice %28 {offsets = [7, 0], sizes = [1, 256], strides = [1, 1]} : vector<8x256xf32> to vector<1x256xf32>
    %50 = arith.cmpf ogt, %49, %46 : vector<1x256xf32>
    %51 = arith.select %50, %49, %46 : vector<1x256xi1>, vector<1x256xf32>
    %cst_12 = arith.constant 2.000000e+00 : f32
    %52 = vector.broadcast %cst_12 : f32 to vector<1x256xf32>
    %53 = arith.select %50, %52, %48 : vector<1x256xi1>, vector<1x256xf32>
    %54 = arith.mulf %41, %51 : vector<1x256xf32>
    %cst_13 = arith.constant 5.000000e-01 : f32
    %55 = vector.broadcast %cst_13 : f32 to vector<1x256xf32>
    %56 = arith.mulf %37, %55 : vector<1x256xf32>
    %cst_14 = arith.constant 5.000000e-01 : f32
    %57 = vector.broadcast %cst_14 : f32 to vector<1x256xf32>
    %58 = arith.mulf %40, %57 : vector<1x256xf32>
    %59 = arith.subf %31, %56 : vector<1x256xf32>
    %60 = arith.subf %34, %58 : vector<1x256xf32>
    %61 = arith.addf %31, %56 : vector<1x256xf32>
    %62 = arith.addf %34, %58 : vector<1x256xf32>
    %c0_15 = arith.constant 0 : index
    %c0_16 = arith.constant 0 : index
    %c0_17 = arith.constant 0 : index
    %63 = vector.load %arg6[%c0_15, %c0_16, %c0_17] : memref<1x6x256xf32, #tpu.memory_space<vmem>>, vector<1x1x256xf32>
    %64 = vector.shape_cast %63 : vector<1x1x256xf32> to vector<1x256xf32>
    %65 = vector.shape_cast %59 : vector<1x256xf32> to vector<1x1x256xf32>
    tpu.vector_store %arg6[%c0_15, %c0_16, %c0_17], %65 {strides = array<i32>} : memref<1x6x256xf32, #tpu.memory_space<vmem>>, vector<1x1x256xf32>,
    %c0_18 = arith.constant 0 : index
    %c0_19 = arith.constant 0 : index
    %c0_20 = arith.constant 0 : index
    %66 = vector.load %arg7[%c0_18, %c0_19, %c0_20] : memref<1x6x256xf32, #tpu.memory_space<vmem>>, vector<1x1x256xf32>
    %67 = vector.shape_cast %66 : vector<1x1x256xf32> to vector<1x256xf32>
    %68 = vector.shape_cast %31 : vector<1x256xf32> to vector<1x1x256xf32>
    tpu.vector_store %arg7[%c0_18, %c0_19, %c0_20], %68 {strides = array<i32>} : memref<1x6x256xf32, #tpu.memory_space<vmem>>, vector<1x1x256xf32>,
    %c0_21 = arith.constant 0 : index
    %c1 = arith.constant 1 : index
    %c0_22 = arith.constant 0 : index
    %69 = vector.load %arg6[%c0_21, %c1, %c0_22] : memref<1x6x256xf32, #tpu.memory_space<vmem>>, vector<1x1x256xf32>
    %70 = vector.shape_cast %69 : vector<1x1x256xf32> to vector<1x256xf32>
    %71 = vector.shape_cast %60 : vector<1x256xf32> to vector<1x1x256xf32>
    tpu.vector_store %arg6[%c0_21, %c1, %c0_22], %71 {strides = array<i32>} : memref<1x6x256xf32, #tpu.memory_space<vmem>>, vector<1x1x256xf32>,
    %c0_23 = arith.constant 0 : index
    %c1_24 = arith.constant 1 : index
    %c0_25 = arith.constant 0 : index
    %72 = vector.load %arg7[%c0_23, %c1_24, %c0_25] : memref<1x6x256xf32, #tpu.memory_space<vmem>>, vector<1x1x256xf32>
    %73 = vector.shape_cast %72 : vector<1x1x256xf32> to vector<1x256xf32>
    %74 = vector.shape_cast %34 : vector<1x256xf32> to vector<1x1x256xf32>
    tpu.vector_store %arg7[%c0_23, %c1_24, %c0_25], %74 {strides = array<i32>} : memref<1x6x256xf32, #tpu.memory_space<vmem>>, vector<1x1x256xf32>,
    %c0_26 = arith.constant 0 : index
    %c2 = arith.constant 2 : index
    %c0_27 = arith.constant 0 : index
    %75 = vector.load %arg6[%c0_26, %c2, %c0_27] : memref<1x6x256xf32, #tpu.memory_space<vmem>>, vector<1x1x256xf32>
    %76 = vector.shape_cast %75 : vector<1x1x256xf32> to vector<1x256xf32>
    %77 = vector.shape_cast %61 : vector<1x256xf32> to vector<1x1x256xf32>
    tpu.vector_store %arg6[%c0_26, %c2, %c0_27], %77 {strides = array<i32>} : memref<1x6x256xf32, #tpu.memory_space<vmem>>, vector<1x1x256xf32>,
    %c0_28 = arith.constant 0 : index
    %c2_29 = arith.constant 2 : index
    %c0_30 = arith.constant 0 : index
    %78 = vector.load %arg7[%c0_28, %c2_29, %c0_30] : memref<1x6x256xf32, #tpu.memory_space<vmem>>, vector<1x1x256xf32>
    %79 = vector.shape_cast %78 : vector<1x1x256xf32> to vector<1x256xf32>
    %80 = vector.shape_cast %37 : vector<1x256xf32> to vector<1x1x256xf32>
    tpu.vector_store %arg7[%c0_28, %c2_29, %c0_30], %80 {strides = array<i32>} : memref<1x6x256xf32, #tpu.memory_space<vmem>>, vector<1x1x256xf32>,
    %c0_31 = arith.constant 0 : index
    %c3 = arith.constant 3 : index
    %c0_32 = arith.constant 0 : index
    %81 = vector.load %arg6[%c0_31, %c3, %c0_32] : memref<1x6x256xf32, #tpu.memory_space<vmem>>, vector<1x1x256xf32>
    %82 = vector.shape_cast %81 : vector<1x1x256xf32> to vector<1x256xf32>
    %83 = vector.shape_cast %62 : vector<1x256xf32> to vector<1x1x256xf32>
    tpu.vector_store %arg6[%c0_31, %c3, %c0_32], %83 {strides = array<i32>} : memref<1x6x256xf32, #tpu.memory_space<vmem>>, vector<1x1x256xf32>,
    %c0_33 = arith.constant 0 : index
    %c3_34 = arith.constant 3 : index
    %c0_35 = arith.constant 0 : index
    %84 = vector.load %arg7[%c0_33, %c3_34, %c0_35] : memref<1x6x256xf32, #tpu.memory_space<vmem>>, vector<1x1x256xf32>
    %85 = vector.shape_cast %84 : vector<1x1x256xf32> to vector<1x256xf32>
    %86 = vector.shape_cast %40 : vector<1x256xf32> to vector<1x1x256xf32>
    tpu.vector_store %arg7[%c0_33, %c3_34, %c0_35], %86 {strides = array<i32>} : memref<1x6x256xf32, #tpu.memory_space<vmem>>, vector<1x1x256xf32>,
    %c0_36 = arith.constant 0 : index
    %c4 = arith.constant 4 : index
    %c0_37 = arith.constant 0 : index
    %87 = vector.load %arg6[%c0_36, %c4, %c0_37] : memref<1x6x256xf32, #tpu.memory_space<vmem>>, vector<1x1x256xf32>
    %88 = vector.shape_cast %87 : vector<1x1x256xf32> to vector<1x256xf32>
    %89 = vector.shape_cast %54 : vector<1x256xf32> to vector<1x1x256xf32>
    tpu.vector_store %arg6[%c0_36, %c4, %c0_37], %89 {strides = array<i32>} : memref<1x6x256xf32, #tpu.memory_space<vmem>>, vector<1x1x256xf32>,
    %c0_38 = arith.constant 0 : index
    %c4_39 = arith.constant 4 : index
    %c0_40 = arith.constant 0 : index
    %90 = vector.load %arg7[%c0_38, %c4_39, %c0_40] : memref<1x6x256xf32, #tpu.memory_space<vmem>>, vector<1x1x256xf32>
    %91 = vector.shape_cast %90 : vector<1x1x256xf32> to vector<1x256xf32>
    %92 = vector.shape_cast %54 : vector<1x256xf32> to vector<1x1x256xf32>
    tpu.vector_store %arg7[%c0_38, %c4_39, %c0_40], %92 {strides = array<i32>} : memref<1x6x256xf32, #tpu.memory_space<vmem>>, vector<1x1x256xf32>,
    %c0_41 = arith.constant 0 : index
    %c5 = arith.constant 5 : index
    %c0_42 = arith.constant 0 : index
    %93 = vector.load %arg6[%c0_41, %c5, %c0_42] : memref<1x6x256xf32, #tpu.memory_space<vmem>>, vector<1x1x256xf32>
    %94 = vector.shape_cast %93 : vector<1x1x256xf32> to vector<1x256xf32>
    %95 = vector.shape_cast %53 : vector<1x256xf32> to vector<1x1x256xf32>
    tpu.vector_store %arg6[%c0_41, %c5, %c0_42], %95 {strides = array<i32>} : memref<1x6x256xf32, #tpu.memory_space<vmem>>, vector<1x1x256xf32>,
    %c0_43 = arith.constant 0 : index
    %c5_44 = arith.constant 5 : index
    %c0_45 = arith.constant 0 : index
    %96 = vector.load %arg7[%c0_43, %c5_44, %c0_45] : memref<1x6x256xf32, #tpu.memory_space<vmem>>, vector<1x1x256xf32>
    %97 = vector.shape_cast %96 : vector<1x1x256xf32> to vector<1x256xf32>
    %98 = vector.shape_cast %53 : vector<1x256xf32> to vector<1x1x256xf32>
    tpu.vector_store %arg7[%c0_43, %c5_44, %c0_45], %98 {strides = array<i32>} : memref<1x6x256xf32, #tpu.memory_space<vmem>>, vector<1x1x256xf32>,
    %99 = arith.index_cast %arg0 : i32 to index
    %c0_46 = arith.constant 0 : index
    %100 = memref.load %arg5[%99, %c0_46] : memref<2x6xf32, #tpu.memory_space<smem>>
    %101 = arith.index_cast %arg0 : i32 to index
    %c1_47 = arith.constant 1 : index
    %102 = memref.load %arg5[%101, %c1_47] : memref<2x6xf32, #tpu.memory_space<smem>>
    %103 = arith.index_cast %arg0 : i32 to index
    %c2_48 = arith.constant 2 : index
    %104 = memref.load %arg5[%103, %c2_48] : memref<2x6xf32, #tpu.memory_space<smem>>
    %105 = arith.index_cast %arg0 : i32 to index
    %c3_49 = arith.constant 3 : index
    %106 = memref.load %arg5[%105, %c3_49] : memref<2x6xf32, #tpu.memory_space<smem>>
    %107 = arith.index_cast %arg0 : i32 to index
    %c4_50 = arith.constant 4 : index
    %108 = memref.load %arg5[%107, %c4_50] : memref<2x6xf32, #tpu.memory_space<smem>>
    %109 = arith.index_cast %arg0 : i32 to index
    %c5_51 = arith.constant 5 : index
    %110 = memref.load %arg5[%109, %c5_51] : memref<2x6xf32, #tpu.memory_space<smem>>
    %111 = vector.broadcast %100 : f32 to vector<1x256xf32>
    %112 = arith.mulf %59, %111 : vector<1x256xf32>
    %c0_52 = arith.constant 0 : index
    %c0_53 = arith.constant 0 : index
    %c0_54 = arith.constant 0 : index
    %113 = vector.load %arg8[%c0_52, %c0_53, %c0_54] : memref<1x6x256xf32, #tpu.memory_space<vmem>>, vector<1x1x256xf32>
    %114 = vector.shape_cast %113 : vector<1x1x256xf32> to vector<1x256xf32>
    %115 = vector.shape_cast %112 : vector<1x256xf32> to vector<1x1x256xf32>
    tpu.vector_store %arg8[%c0_52, %c0_53, %c0_54], %115 {strides = array<i32>} : memref<1x6x256xf32, #tpu.memory_space<vmem>>, vector<1x1x256xf32>,
    %116 = vector.broadcast %100 : f32 to vector<1x256xf32>
    %117 = arith.mulf %31, %116 : vector<1x256xf32>
    %c0_55 = arith.constant 0 : index
    %c0_56 = arith.constant 0 : index
    %c0_57 = arith.constant 0 : index
    %118 = vector.load %arg9[%c0_55, %c0_56, %c0_57] : memref<1x6x256xf32, #tpu.memory_space<vmem>>, vector<1x1x256xf32>
    %119 = vector.shape_cast %118 : vector<1x1x256xf32> to vector<1x256xf32>
    %120 = vector.shape_cast %117 : vector<1x256xf32> to vector<1x1x256xf32>
    tpu.vector_store %arg9[%c0_55, %c0_56, %c0_57], %120 {strides = array<i32>} : memref<1x6x256xf32, #tpu.memory_space<vmem>>, vector<1x1x256xf32>,
    %121 = vector.broadcast %102 : f32 to vector<1x256xf32>
    %122 = arith.mulf %60, %121 : vector<1x256xf32>
    %c0_58 = arith.constant 0 : index
    %c1_59 = arith.constant 1 : index
    %c0_60 = arith.constant 0 : index
    %123 = vector.load %arg8[%c0_58, %c1_59, %c0_60] : memref<1x6x256xf32, #tpu.memory_space<vmem>>, vector<1x1x256xf32>
    %124 = vector.shape_cast %123 : vector<1x1x256xf32> to vector<1x256xf32>
    %125 = vector.shape_cast %122 : vector<1x256xf32> to vector<1x1x256xf32>
    tpu.vector_store %arg8[%c0_58, %c1_59, %c0_60], %125 {strides = array<i32>} : memref<1x6x256xf32, #tpu.memory_space<vmem>>, vector<1x1x256xf32>,
    %126 = vector.broadcast %102 : f32 to vector<1x256xf32>
    %127 = arith.mulf %34, %126 : vector<1x256xf32>
    %c0_61 = arith.constant 0 : index
    %c1_62 = arith.constant 1 : index
    %c0_63 = arith.constant 0 : index
    %128 = vector.load %arg9[%c0_61, %c1_62, %c0_63] : memref<1x6x256xf32, #tpu.memory_space<vmem>>, vector<1x1x256xf32>
    %129 = vector.shape_cast %128 : vector<1x1x256xf32> to vector<1x256xf32>
    %130 = vector.shape_cast %127 : vector<1x256xf32> to vector<1x1x256xf32>
    tpu.vector_store %arg9[%c0_61, %c1_62, %c0_63], %130 {strides = array<i32>} : memref<1x6x256xf32, #tpu.memory_space<vmem>>, vector<1x1x256xf32>,
    %131 = vector.broadcast %104 : f32 to vector<1x256xf32>
    %132 = arith.mulf %61, %131 : vector<1x256xf32>
    %c0_64 = arith.constant 0 : index
    %c2_65 = arith.constant 2 : index
    %c0_66 = arith.constant 0 : index
    %133 = vector.load %arg8[%c0_64, %c2_65, %c0_66] : memref<1x6x256xf32, #tpu.memory_space<vmem>>, vector<1x1x256xf32>
    %134 = vector.shape_cast %133 : vector<1x1x256xf32> to vector<1x256xf32>
    %135 = vector.shape_cast %132 : vector<1x256xf32> to vector<1x1x256xf32>
    tpu.vector_store %arg8[%c0_64, %c2_65, %c0_66], %135 {strides = array<i32>} : memref<1x6x256xf32, #tpu.memory_space<vmem>>, vector<1x1x256xf32>,
    %136 = vector.broadcast %104 : f32 to vector<1x256xf32>
    %137 = arith.mulf %37, %136 : vector<1x256xf32>
    %c0_67 = arith.constant 0 : index
    %c2_68 = arith.constant 2 : index
    %c0_69 = arith.constant 0 : index
    %138 = vector.load %arg9[%c0_67, %c2_68, %c0_69] : memref<1x6x256xf32, #tpu.memory_space<vmem>>, vector<1x1x256xf32>
    %139 = vector.shape_cast %138 : vector<1x1x256xf32> to vector<1x256xf32>
    %140 = vector.shape_cast %137 : vector<1x256xf32> to vector<1x1x256xf32>
    tpu.vector_store %arg9[%c0_67, %c2_68, %c0_69], %140 {strides = array<i32>} : memref<1x6x256xf32, #tpu.memory_space<vmem>>, vector<1x1x256xf32>,
    %141 = vector.broadcast %106 : f32 to vector<1x256xf32>
    %142 = arith.mulf %62, %141 : vector<1x256xf32>
    %c0_70 = arith.constant 0 : index
    %c3_71 = arith.constant 3 : index
    %c0_72 = arith.constant 0 : index
    %143 = vector.load %arg8[%c0_70, %c3_71, %c0_72] : memref<1x6x256xf32, #tpu.memory_space<vmem>>, vector<1x1x256xf32>
    %144 = vector.shape_cast %143 : vector<1x1x256xf32> to vector<1x256xf32>
    %145 = vector.shape_cast %142 : vector<1x256xf32> to vector<1x1x256xf32>
    tpu.vector_store %arg8[%c0_70, %c3_71, %c0_72], %145 {strides = array<i32>} : memref<1x6x256xf32, #tpu.memory_space<vmem>>, vector<1x1x256xf32>,
    %146 = vector.broadcast %106 : f32 to vector<1x256xf32>
    %147 = arith.mulf %40, %146 : vector<1x256xf32>
    %c0_73 = arith.constant 0 : index
    %c3_74 = arith.constant 3 : index
    %c0_75 = arith.constant 0 : index
    %148 = vector.load %arg9[%c0_73, %c3_74, %c0_75] : memref<1x6x256xf32, #tpu.memory_space<vmem>>, vector<1x1x256xf32>
    %149 = vector.shape_cast %148 : vector<1x1x256xf32> to vector<1x256xf32>
    %150 = vector.shape_cast %147 : vector<1x256xf32> to vector<1x1x256xf32>
    tpu.vector_store %arg9[%c0_73, %c3_74, %c0_75], %150 {strides = array<i32>} : memref<1x6x256xf32, #tpu.memory_space<vmem>>, vector<1x1x256xf32>,
    %151 = vector.broadcast %108 : f32 to vector<1x256xf32>
    %152 = arith.mulf %54, %151 : vector<1x256xf32>
    %c0_76 = arith.constant 0 : index
    %c4_77 = arith.constant 4 : index
    %c0_78 = arith.constant 0 : index
    %153 = vector.load %arg8[%c0_76, %c4_77, %c0_78] : memref<1x6x256xf32, #tpu.memory_space<vmem>>, vector<1x1x256xf32>
    %154 = vector.shape_cast %153 : vector<1x1x256xf32> to vector<1x256xf32>
    %155 = vector.shape_cast %152 : vector<1x256xf32> to vector<1x1x256xf32>
    tpu.vector_store %arg8[%c0_76, %c4_77, %c0_78], %155 {strides = array<i32>} : memref<1x6x256xf32, #tpu.memory_space<vmem>>, vector<1x1x256xf32>,
    %156 = vector.broadcast %108 : f32 to vector<1x256xf32>
    %157 = arith.mulf %54, %156 : vector<1x256xf32>
    %c0_79 = arith.constant 0 : index
    %c4_80 = arith.constant 4 : index
    %c0_81 = arith.constant 0 : index
    %158 = vector.load %arg9[%c0_79, %c4_80, %c0_81] : memref<1x6x256xf32, #tpu.memory_space<vmem>>, vector<1x1x256xf32>
    %159 = vector.shape_cast %158 : vector<1x1x256xf32> to vector<1x256xf32>
    %160 = vector.shape_cast %157 : vector<1x256xf32> to vector<1x1x256xf32>
    tpu.vector_store %arg9[%c0_79, %c4_80, %c0_81], %160 {strides = array<i32>} : memref<1x6x256xf32, #tpu.memory_space<vmem>>, vector<1x1x256xf32>,
    %161 = vector.broadcast %110 : f32 to vector<1x256xf32>
    %162 = arith.mulf %53, %161 : vector<1x256xf32>
    %c0_82 = arith.constant 0 : index
    %c5_83 = arith.constant 5 : index
    %c0_84 = arith.constant 0 : index
    %163 = vector.load %arg8[%c0_82, %c5_83, %c0_84] : memref<1x6x256xf32, #tpu.memory_space<vmem>>, vector<1x1x256xf32>
    %164 = vector.shape_cast %163 : vector<1x1x256xf32> to vector<1x256xf32>
    %165 = vector.shape_cast %162 : vector<1x256xf32> to vector<1x1x256xf32>
    tpu.vector_store %arg8[%c0_82, %c5_83, %c0_84], %165 {strides = array<i32>} : memref<1x6x256xf32, #tpu.memory_space<vmem>>, vector<1x1x256xf32>,
    %166 = vector.broadcast %110 : f32 to vector<1x256xf32>
    %167 = arith.mulf %53, %166 : vector<1x256xf32>
    %c0_85 = arith.constant 0 : index
    %c5_86 = arith.constant 5 : index
    %c0_87 = arith.constant 0 : index
    %168 = vector.load %arg9[%c0_85, %c5_86, %c0_87] : memref<1x6x256xf32, #tpu.memory_space<vmem>>, vector<1x1x256xf32>
    %169 = vector.shape_cast %168 : vector<1x1x256xf32> to vector<1x256xf32>
    %170 = vector.shape_cast %167 : vector<1x256xf32> to vector<1x1x256xf32>
    tpu.vector_store %arg9[%c0_85, %c5_86, %c0_87], %170 {strides = array<i32>} : memref<1x6x256xf32, #tpu.memory_space<vmem>>, vector<1x1x256xf32>,
    %cst_88 = arith.constant 2.500000e-01 : f32
    %171 = vector.broadcast %cst_88 : f32 to vector<1x256xf32>
    %172 = arith.cmpf ogt, %54, %171 : vector<1x256xf32>
    %173 = arith.extui %172 : vector<1x256xi1> to vector<1x256xi32>
    %174 = arith.sitofp %173 : vector<1x256xi32> to vector<1x256xf32>
    %c0_89 = arith.constant 0 : index
    %c0_90 = arith.constant 0 : index
    %c0_91 = arith.constant 0 : index
    %175 = vector.load %arg10[%c0_89, %c0_90, %c0_91] : memref<1x1x256xf32, #tpu.memory_space<vmem>>, vector<1x1x256xf32>
    %176 = vector.shape_cast %175 : vector<1x1x256xf32> to vector<1x256xf32>
    %177 = vector.shape_cast %174 : vector<1x256xf32> to vector<1x1x256xf32>
    tpu.vector_store %arg10[%c0_89, %c0_90, %c0_91], %177 {strides = array<i32>} : memref<1x1x256xf32, #tpu.memory_space<vmem>>, vector<1x1x256xf32>,
    return
  }
  func.func @transform_0(%arg0: i32, %arg1: i32) -> (i32, i32, i32) {
    %c0_i32 = arith.constant 0 : i32
    %c0_i32_0 = arith.constant 0 : i32
    return %arg0, %c0_i32, %arg1 : i32, i32, i32
  }
  func.func @transform_1(%arg0: i32, %arg1: i32) -> (i32, i32) {
    %c0_i32 = arith.constant 0 : i32
    %c0_i32_0 = arith.constant 0 : i32
    %c0_i32_1 = arith.constant 0 : i32
    return %c0_i32, %c0_i32_0 : i32, i32
  }
  func.func @transform_2(%arg0: i32, %arg1: i32) -> (i32, i32) {
    %c0_i32 = arith.constant 0 : i32
    %c0_i32_0 = arith.constant 0 : i32
    %c0_i32_1 = arith.constant 0 : i32
    return %c0_i32, %c0_i32_0 : i32, i32
  }
  func.func @transform_3(%arg0: i32, %arg1: i32) -> (i32, i32) {
    %c0_i32 = arith.constant 0 : i32
    %c0_i32_0 = arith.constant 0 : i32
    %c0_i32_1 = arith.constant 0 : i32
    return %c0_i32, %c0_i32_0 : i32, i32
  }
  func.func @transform_4(%arg0: i32, %arg1: i32) -> (i32, i32, i32) {
    %c0_i32 = arith.constant 0 : i32
    %c0_i32_0 = arith.constant 0 : i32
    return %arg0, %c0_i32, %arg1 : i32, i32, i32
  }
  func.func @transform_5(%arg0: i32, %arg1: i32) -> (i32, i32, i32) {
    %c0_i32 = arith.constant 0 : i32
    %c0_i32_0 = arith.constant 0 : i32
    return %arg0, %c0_i32, %arg1 : i32, i32, i32
  }
  func.func @transform_6(%arg0: i32, %arg1: i32) -> (i32, i32, i32) {
    %c0_i32 = arith.constant 0 : i32
    %c0_i32_0 = arith.constant 0 : i32
    return %arg0, %c0_i32, %arg1 : i32, i32, i32
  }
  func.func @transform_7(%arg0: i32, %arg1: i32) -> (i32, i32, i32) {
    %c0_i32 = arith.constant 0 : i32
    %c0_i32_0 = arith.constant 0 : i32
    return %arg0, %c0_i32, %arg1 : i32, i32, i32
  }
  func.func @transform_8(%arg0: i32, %arg1: i32) -> (i32, i32, i32) {
    %c0_i32 = arith.constant 0 : i32
    %c0_i32_0 = arith.constant 0 : i32
    return %arg0, %c0_i32, %arg1 : i32, i32, i32
  }
}

</mosaic_0001>

<bundles_post_ra>
// kernel: tpu_custom_call.1
= control target key start
LH: loop header
LB: loop body
LE: loop exit
PB: predicated region body
PF: predicated region fallthrough
CT: control target
= control target key end

     0   :  { %s2030_s0 = inlined_call_operand.vmem [shape: bf16[2,3,256], index: 0, kind: input, shape index: {}]   ;;  %s2031_s1 = inlined_call_operand.vmem [shape: f32[8,3], index: 1, kind: input, shape index: {}]   ;;  %s2032_s2 = inlined_call_operand.vmem [shape: f32[8,1], index: 2, kind: input, shape index: {}]   ;;  %s2033_s3 = inlined_call_operand.vmem [shape: f32[2,6], index: 3, kind: input, shape index: {}]   ;;  %s2034_s4 = inlined_call_operand.vmem [shape: f32[2,6,256], index: 4, kind: output, shape index: {0}]   ;;  %s2035_s5 = inlined_call_operand.vmem [shape: f32[2,6,256], index: 5, kind: output, shape index: {1}]   ;;  %s2036_s6 = inlined_call_operand.vmem [shape: f32[2,6,256], index: 6, kind: output, shape index: {2}]   ;;  %s2037_s7 = inlined_call_operand.vmem [shape: f32[2,6,256], index: 7, kind: output, shape index: {3}]   ;;  %s2038_s8 = inlined_call_operand.hbm [shape: f32[2,1,256], index: 8, kind: output, shape index: {4}]  }
   0x1   :  { %2039 = sst [smem:[#allocation8_spill]] %s2030_s0 }
   0x2   :  { %14 = vsyncpa [#allocation4], 0 }
   0x3   :  { %15 = vsyncpa [#allocation3], 0 }
   0x4   :  { %17 = vsyncpa [#allocation3 + $0x1], 0  ;;  %s1634_s27 = smov 0   ;;  %s1636_s28 = smov 0  }
   0x5   :  { %s1638_s29 = smov 0   ;;  %s1640_s30 = smov 0  }
   0x6   :  { %s1642_s9 = smov 0   ;;  %s1644_s10 = smov 0  }
   0x7 LB: > { %s1346_s11 = sadd.s32 4294967295, %s1580_s10   ;;  %s1347_s12 = sadd.s32 4294967294, %s1580_s10   ;;  %s1580_s10 = sphi %s1644_s10, %s23_s10   ;;  %s1576_s9 = sphi %s1642_s9, %s2051_s9   ;;  %s1572_s30 = sphi %s1640_s30, %s2050_s30   ;;  %s1568_s29 = sphi %s1638_s29, %s2049_s29   ;;  %s1564_s28 = sphi %s1636_s28, %s2048_s28   ;;  %s1560_s27 = sphi %s1634_s27, %s2047_s27  }
   0x8   : > { %s35_s13 = sadd.s32 1, %s1576_s9  ;;  %s247_s14 = sadd.s32 1, %s1568_s29 }
   0x9   : > { %p37_p0 = scmp.ge.s32.totalorder %s35_s13, 2  ;;  %p257_p1 = scmp.ne.s32.totalorder %s1568_s29, %s1564_s28 }
   0xa   : > { %p258_p2 = scmp.eq.s32.totalorder %s1346_s11, 1  ;;  %p263_p3 = scmp.ne.s32.totalorder %s1564_s28, %s1560_s27 }
   0xb   : > { %s2053_s13 = smov (%p37_p0, %s35_s13), 0  ;;  %p264_p5 = scmp.eq.s32.totalorder %s1347_s12, 1 }
   0xc   : > { %p1674_p4 = por %p258_p2, %p257_p1  ;;  %s242_s16 = ssub.s32 %s1576_s9, %s2053_s13 }
   0xd   : > { %p1348_p6 = scmp.ge.s32.totalorder %s1580_s10, 1  ;;  %p245_p7 = scmp.eq.s32.totalorder %s242_s16, 0 }
   0xe   : > { %p1681_p8 = por %p264_p5, %p263_p3  ;;  %p271_p9 = scmp.lt.s32.totalorder %s1580_s10, 3 }
   0xf   : > { %s1687_s18 = scalar_select %p245_p7, %s1568_s29, %s247_s14  }
  0x10   : > { %p1689_p10 = pnand %p1348_p6, %p271_p9  ;;  %p1693_p11 = scmp.eq.s32.totalorder %s1346_s11, 0 }
  0x11   : > { %s290_s23 = sshll.u32 %s2033_s3, 4  ;;  %s291_s23 = int_to_ptr.vmem [resolvable:$true] %s290_s23 }
  0x12   : > { %p1406_p12 = pneg %p1689_p10  ;;  %s1483_s24 = scalar_lea.vmem %s291_s23, 32 }
  0x13   : > { %p1484_p0 = scmp.ne.s32.totalorder %s291_s23, %s1483_s24  ;;  %p1491_p5 = scmp.lt.s32.totalorder %s291_s23, %s291_s23 }
  0x14   : > { %p1407_p13 = pnand %p1693_p11, %p1406_p12  ;;  %p1492_p6 = scmp.lt.s32.totalorder %s1483_s24, %s1483_s24 }
  0x16   : > { %p1485_p1 = pneg %p1407_p13  ;;  %p1493_p7 = por %p1492_p6, %p1491_p5 }
  0x18   : > { %p1486_p2 = pnand %p1485_p1, %p1484_p0 }
  0x1a   : > { %p1487_p3 = pneg %p1486_p2 }
  0x1c   : > { %p1494_p9 = pnand %p1493_p7, %p1487_p3 }
  0x1e   : > { %1497 = shalt.err (!%p1494_p9)
}
  0x1f   : > { %s1582_s25 = smov [#allocation2]   ;;  %316 = sbr.rel (%p1689_p10) target bundleno = 260 (0x104), region = 36 }
  0x20   : > { %1409 = dma.vmem_to_smem (!%p1407_p13), %s291_s23, 32, %s1582_s25, [#allocation4]  }
  0x26   : > { %1551 = dma.done.wait (%p1693_p11), [#allocation4], 32  }
  0x27   : > { %1553 = vsyncadd (%p1693_p11), [#allocation4], 4294967264 }
  0x28   : > { %322 = sfence }
  0x29   : > { %v444_v0 = vld [vmem:[%s2031_s1] sm:$0xff]  ;;  %v1583_v1 = vmov 0   ;;  %v1584_v2 = vmov 1   ;;  %v1585_v4 = vmov 2   ;;  %p392_p10 = scmp.lt.s32.totalorder %s1572_s30, 1  ;;  %v452_v5 = vlaneseq  ;;  %s2044_s0 = sld [smem:[#allocation8_spill]] }
  0x2a   : > { %1471 = vset.pattern.permute.xlu0 %v1583_v1  ;;  %1472 = vset.pattern.permute.xlu1 %v1584_v2  ;;  %v445_v3 = vld [vmem:[%s2032_s2] sm:$0xff]  ;;  %s1376_s23 = sshll.u32 %s1572_s30, 7  ;;  %v1586_v49 = vmov 1966171168  }
  0x2b   : > { %448 = vperm.xlu0 %1471, %v444_v0   ;;  %480 = vperm.xlu1 %1472, %v444_v0   ;;  %s1718_s16 = scalar_select %p392_p10, %s1572_s30, 1  ;;  %v1725_v6 = vshrl.u32 %v452_v5, 7  ;;  %v599_v50 = vunpack.c.l.s4 %v1586_v49  ;;  %vm1754_vm0 = vcmp.lt.s32.totalorder %v452_v5, 256 }
  0x2c   : > { %s758_s24 = sadd.s32 1, %s1376_s23  ;;  %s760_s25 = sadd.s32 2, %s1376_s23 }
  0x2d   : > { %s1394_s19 = sshll.u32 %s1718_s16, 2  ;;  %v454_v8 = vsub.s32 0, %v1725_v6  ;;  %v458_v9 = vsub.s32 4, %v1725_v6  ;;  %v485_v11 = vsub.s32 1, %v1725_v6  ;;  %v489_v12 = vsub.s32 5, %v1725_v6  ;;  %s762_s26 = sadd.s32 3, %s1376_s23 }
  0x2e   : > { %v511_v13 = vsub.s32 2, %v1725_v6  ;;  %v515_v14 = vsub.s32 6, %v1725_v6  ;;  %s764_s11 = sadd.s32 4, %s1376_s23  ;;  %s766_s12 = sadd.s32 5, %s1376_s23  ;;  %v600_v51 = vunpack.c.0.s8 %v599_v50 }
  0x2f   : > { %474 = vperm.xlu0 %1471, %v445_v3   ;;  %1473 = vset.pattern.permute.xlu1 %v1585_v4  ;;  %s399_s22 = scalar_lea.vmem %s2044_s0, %s1394_s19  ;;  %s757_s14 = sld [smem:[#allocation2 + %s1376_s23]] }
  0x30   : > { %506 = vperm.xlu1 %1473, %v444_v0   ;;  %v442_v7 = vld [vmem:[%s399_s22] sm:$0xf]  ;;  %s759_s19 = sld [smem:[#allocation2 + %s758_s24]]  ;;  %v1739_v53 = vsub.s32 %v600_v51, %v1725_v6  ;;  %s1777_s23 = sshll.u32 %s1718_s16, 4 }
  0x31   : > { %v443_v10 = vunpack.c.l.bf16 %v442_v7  ;;  %s761_s20 = sld [smem:[#allocation2 + %s760_s25]]  ;;  %v1587_v7 = vmov 0.0   ;;  %s1796_s25 = scalar_lea.vmem %s2035_s5, %s1777_s23 }
  0x32   : > { %s763_s21 = sld [smem:[#allocation2 + %s762_s26]]  ;;  %s1849_s24 = scalar_lea.vmem %s2037_s7, %s1777_s23 }
  0x33   : > { %1474 = vset.pattern.permute.xlu0 %v1585_v4  ;;  %v455_v15 = vrot.slane %v443_v10, %v454_v8  ;;  %v459_v16 = vrot.slane %v443_v10, %v458_v9  ;;  %v486_v17 = vrot.slane %v443_v10, %v485_v11  ;;  %v490_v18 = vrot.slane %v443_v10, %v489_v12  ;;  %s1734_s22 = sld [smem:[#allocation2 + %s764_s11]] }
  0x34   : > { %v512_v19 = vrot.slane %v443_v10, %v511_v13  ;;  %v516_v20 = vrot.slane %v443_v10, %v515_v14  ;;  %s1736_s0 = sld [smem:[#allocation2 + %s766_s12]]  ;;  %s1814_s12 = scalar_lea.vmem %s2034_s4, %s1777_s23 }
  0x35   : > { %v465_v21 = vrot.slane %v455_v15, %v454_v8  ;;  %v469_v22 = vrot.slane %v459_v16, %v454_v8  ;;  %v496_v25 = vrot.slane %v486_v17, %v485_v11  ;;  %v500_v26 = vrot.slane %v490_v18, %v485_v11 }
  0x36   : > { %v522_v27 = vrot.slane %v512_v19, %v511_v13  ;;  %v526_v28 = vrot.slane %v516_v20, %v511_v13  ;;  %v768_v54 = vstv %s757_s14  ;;  %v1741_v55 = vstv %s759_s19 }
  0x37   : > { %v1745_v59 = vstv %s761_s20  ;;  %s1843_s20 = scalar_lea.vmem %s2036_s6, %s1777_s23  ;;  %s388_s23 = sand.u32 1, %s1564_s28  }
  0x38   : > { %v1747_v60 = vstv %s763_s21  ;;  %s1078_s14 = scalar_lea.sflag [#allocation3], %s388_s23  ;;  %s1588_s21 = smov [#allocation5]  }
  0x39   : > { %v960_v63 = vstv %s1734_s22  ;;  %s1502_s16 = sshll.u32 %s1588_s21, 4  ;;  %s1503_s16 = int_to_ptr.vmem [resolvable:$false] %s1502_s16 }
  0x3a   : > { %v987_v0 = vstv %s1736_s0  ;;  %s1399_s0 = sshll.u32 %s1572_s30, 5 }
  0xaa   : > { %v449_v23 = vpop.permute.xlu0 %448  ;;  %v481_v24 = vpop.permute.xlu1 %480 }
  0xab   : > { %v470_v29 = vmul.f32 %v465_v21, %v449_v23  ;;  %v471_v30 = vmul.f32 %v469_v22, %v449_v23  ;;  %v501_v32 = vmul.f32 %v496_v25, %v481_v24  ;;  %v502_v33 = vmul.f32 %v500_v26, %v481_v24 }
  0xae   : > { %v475_v31 = vpop.permute.xlu0 %474 }
  0xaf   : > { %v477_v34 = vadd.f32 %v475_v31, %v470_v29  ;;  %v478_v35 = vadd.f32 %v475_v31, %v471_v30  ;;  %v507_v36 = vpop.permute.xlu1 %506 }
  0xb0   : > { %v527_v37 = vmul.f32 %v522_v27, %v507_v36  ;;  %v528_v38 = vmul.f32 %v526_v28, %v507_v36 }
  0xb1   : > { %v503_v39 = vadd.f32 %v501_v32, %v477_v34  ;;  %v504_v40 = vadd.f32 %v502_v33, %v478_v35 }
  0xb3   : > { %v529_v41 = vadd.f32 %v527_v37, %v503_v39  ;;  %v530_v42 = vadd.f32 %v528_v38, %v504_v40 }
  0xb5   : > { %v1364_v43 = vmul.f32 -1.442695, %v529_v41  ;;  %v1365_v44 = vmul.f32 -1.442695, %v530_v42 }
  0xb7   : > { %1475 = vpow2.f32 %v1364_v43 }
  0xb8   : > { %1477 = vpow2.f32 %v1365_v44 }
  0xc1   : > { %v1476_v45 = vpop.eup %1475 }
  0xc2   : > { %v1478_v46 = vpop.eup %1477  ;;  %v537_v47 = vadd.f32 1.0, %v1476_v45 }
  0xc3   : > { %v538_v48 = vadd.f32 1.0, %v1478_v46 }
  0xc4   : > { %1479 = vrcp.f32 %v537_v47 }
  0xc5   : > { %1481 = vrcp.f32 %v538_v48 }
  0xce   : > { %v1480_v52 = vpop.eup %1479 }
  0xcf   : > { %v1482_v56 = vpop.eup %1481  ;;  %v1743_v57 = vmul.f32 16.0, %v1480_v52  ;;  %v547_v58 = vrot.slane %v1480_v52, 7 }
  0xd0   : > { %v1749_v61 = vmul.f32 16.0, %v1482_v56  ;;  %v548_v62 = vrot.slane %v1482_v56, 7 }
  0xd1   : > { %vm551_vm1 = vcmp.gt.f32.partialorder %v1480_v52, %v547_v58  ;;  %v583_v2 = vmul.f32 0.5, %v1743_v57  ;;  %v1760_v3 = vmul.f32 %v768_v54, %v1743_v57  ;;  %v1764_v4 = vmul.f32 %v1741_v55, %v1743_v57 }
  0xd2   : > { %vm552_vm2 = vcmp.gt.f32.partialorder %v1482_v56, %v548_v62  ;;  %v553_v6 = vsel %vm551_vm1, %v1480_v52, %v547_v58  ;;  %v555_v8 = vsel %vm551_vm1, 1.0, %v1587_v7  ;;  %v584_v5 = vmul.f32 0.5, %v1749_v61 }
  0xd3   : > { %v554_v9 = vsel %vm552_vm2, %v1482_v56, %v548_v62  ;;  %v556_v10 = vsel %vm552_vm2, 1.0, %v1587_v7  ;;  %v559_v11 = vrot.slane %v553_v6, 7  ;;  %v569_v12 = vrot.slane %v555_v8, 7 }
  0xd4   : > { %v560_v13 = vrot.slane %v554_v9, 7  ;;  %v570_v14 = vrot.slane %v556_v10, 7  ;;  %v587_v15 = vrot.slane %v583_v2, 2  ;;  %v588_v16 = vrot.slane %v584_v5, 2 }
  0xd5   : > { %vm563_vm3 = vcmp.gt.f32.partialorder %v1480_v52, %v559_v11  ;;  %v621_v17 = vcombine.low %v1743_v57, %v1749_v61  ;;  %v792_v18 = vmul.f32 %v768_v54, %v1749_v61  ;;  %v1774_v19 = vmul.f32 %v1741_v55, %v1749_v61 }
  0xd6   : > { %vm564_vm4 = vcmp.gt.f32.partialorder %v1482_v56, %v560_v13  ;;  %v565_v20 = vsel %vm563_vm3, %v1480_v52, %v559_v11  ;;  %v1779_v21 = vsel %vm563_vm3, 2.0, %v569_v12  ;;  %v591_v22 = vsub.f32 %v1743_v57, %v587_v15 }
  0xd7   : > { %v566_v23 = vsel %vm564_vm4, %v1482_v56, %v560_v13  ;;  %v1782_v24 = vsel %vm564_vm4, 2.0, %v570_v14  ;;  %v577_v25 = vrot.slane %v565_v20, 3  ;;  %v592_v26 = vsub.f32 %v1749_v61, %v588_v16 }
  0xd8   : > { %v578_v27 = vrot.slane %v566_v23, 3  ;;  %v1786_v28 = vadd.f32 %v587_v15, %v1743_v57  ;;  %v1789_v29 = vadd.f32 %v588_v16, %v1749_v61  ;;  %v628_v30 = vrot.slane %v621_v17, %v1739_v53 }
  0xd9   : > { %v1798_v31 = vmul.f32 %v1480_v52, %v577_v25  ;;  %v597_v32 = vcombine.low %v591_v22, %v592_v26  ;;  %v732_v33 = vcombine.high %v1779_v21, %v1782_v24  ;;  %v769_v34 = vmul.f32 %v768_v54, %v591_v22 }
  0xda   : > { %v1802_v35 = vmul.f32 %v1482_v56, %v578_v27  ;;  %v635_v36 = vrot.slane %v628_v30, %v1739_v53  ;;  %v651_v37 = vcombine.high %v628_v30, %v628_v30  ;;  %v665_v38 = vcombine.low %v1786_v28, %v1789_v29 }
  0xdb   : > { %v604_v39 = vrot.slane %v597_v32, %v1739_v53  ;;  %v739_v40 = vrot.slane %v732_v33, %v1739_v53  ;;  %v770_v41 = vmul.f32 %v768_v54, %v592_v26  ;;  %v795_v42 = vcombine.low %v1760_v3, %v792_v18 }
  0xdc   : > { %637 = vst.msk [vmem:[%s1796_s25] ss:$8 sm:$0x3] %vm1754_vm0, %v635_v36  ;;  %v658_v43 = vrot.slane %v651_v37, %v1739_v53  ;;  %v672_v44 = vrot.slane %v665_v38, %v1739_v53  ;;  %v684_v45 = vcombine.high %v635_v36, %v635_v36  ;;  %v708_v46 = vcombine.high %v1798_v31, %v1802_v35 }
  0xdd   : > { %v611_v47 = vrot.slane %v604_v39, %v1739_v53  ;;  %v639_v48 = vcombine.high %v604_v39, %v604_v39  ;;  %v740_v49 = vcombine.high %v739_v40, %v739_v40  ;;  %v773_v50 = vcombine.low %v769_v34, %v770_v41 }
  0xde   : > { %1367 = vst.msk [vmem:[%s1796_s25 + $0x1] ss:$8 sm:$0x3] %vm1754_vm0, %v658_v43  ;;  %v679_v51 = vrot.slane %v672_v44, %v1739_v53  ;;  %1369 = vst.msk [vmem:[%s1796_s25 + $0x2] ss:$8 sm:$0x3] %vm1754_vm0, %v684_v45  ;;  %v689_v52 = vcombine.high %v672_v44, %v672_v44  ;;  %v701_v54 = vcombine.high %v658_v43, %v658_v43 }
  0xdf   : > { %v715_v56 = vrot.slane %v708_v46, %v1739_v53  ;;  %617 = vst.msk [vmem:[%s1814_s12] ss:$8 sm:$0x3] %vm1754_vm0, %v611_v47  ;;  %v646_v58 = vrot.slane %v639_v48, %v1739_v53  ;;  %v747_v62 = vrot.slane %v740_v49, %v1739_v53  ;;  %v780_v2 = vrot.slane %v773_v50, %v1739_v53 }
  0xe0   : > { %v802_v3 = vrot.slane %v795_v42, %v1739_v53  ;;  %1368 = vst.msk [vmem:[%s1814_s12 + $0x2] ss:$8 sm:$0x3] %vm1754_vm0, %v679_v51  ;;  %v696_v6 = vrot.slane %v689_v52, %v1739_v53  ;;  %1371 = vst.msk [vmem:[%s1796_s25 + $0x3] ss:$8 sm:$0x3] %vm1754_vm0, %v701_v54  ;;  %v814_v5 = vmul.f32 %v1741_v55, %v591_v22 }
  0xe1   : > { %v722_v8 = vrot.slane %v715_v56, %v1739_v53  ;;  %v815_v9 = vmul.f32 %v1741_v55, %v592_v26  ;;  %1366 = vst.msk [vmem:[%s1814_s12 + $0x1] ss:$8 sm:$0x3] %vm1754_vm0, %v646_v58  ;;  %v748_v10 = vcombine.high %v747_v62, %v747_v62  ;;  %v787_v11 = vrot.slane %v780_v2, %v1739_v53 }
  0xe2   : > { %v809_v12 = vrot.slane %v802_v3, %v1739_v53  ;;  %v842_v13 = vcombine.low %v1764_v4, %v1774_v19  ;;  %1370 = vst.msk [vmem:[%s1814_s12 + $0x3] ss:$8 sm:$0x3] %vm1754_vm0, %v696_v6  ;;  %v863_v14 = vmul.f32 %v1745_v59, %v1786_v28  ;;  %v864_v15 = vmul.f32 %v1745_v59, %v1789_v29 }
  0xe3   : > { %1372 = vst.msk [vmem:[%s1814_s12 + $0x4] ss:$8 sm:$0x3] %vm1754_vm0, %v722_v8  ;;  %1373 = vst.msk [vmem:[%s1796_s25 + $0x4] ss:$8 sm:$0x3] %vm1754_vm0, %v722_v8  ;;  %v818_v55 = vcombine.low %v814_v5, %v815_v9  ;;  %v886_v4 = vmul.f32 %v1745_v59, %v1743_v57  ;;  %v887_v17 = vmul.f32 %v1745_v59, %v1749_v61 }
  0xe4   : > { %1374 = vst.msk [vmem:[%s1814_s12 + $0x5] ss:$8 sm:$0x3] %vm1754_vm0, %v748_v10  ;;  %1375 = vst.msk [vmem:[%s1796_s25 + $0x5] ss:$8 sm:$0x3] %vm1754_vm0, %v748_v10  ;;  %v849_v16 = vrot.slane %v842_v13, %v1739_v53  ;;  %v911_v18 = vmul.f32 %v1747_v60, %v1786_v28  ;;  %v912_v19 = vmul.f32 %v1747_v60, %v1789_v29  ;;  %s1972_s12 = scalar_lea.hbm %s2038_s8, %s1399_s0 }
  0xe5   : > { %789 = vst.msk [vmem:[%s1843_s20] ss:$8 sm:$0x3] %vm1754_vm0, %v787_v11  ;;  %811 = vst.msk [vmem:[%s1849_s24] ss:$8 sm:$0x3] %vm1754_vm0, %v809_v12  ;;  %v825_v20 = vrot.slane %v818_v55, %v1739_v53  ;;  %v867_v22 = vcombine.low %v863_v14, %v864_v15  ;;  %v935_v23 = vmul.f32 %v1747_v60, %v1743_v57 }
  0xe6   : > { %v936_v25 = vmul.f32 %v1747_v60, %v1749_v61  ;;  %v850_v26 = vcombine.high %v849_v16, %v849_v16  ;;  %v890_v59 = vcombine.low %v886_v4, %v887_v17  ;;  %v915_v27 = vcombine.low %v911_v18, %v912_v19  ;;  %s1917_s25 = sshll.u32 %s388_s23, 1 }
  0xe7   : > { %v961_v28 = vmul.f32 %v960_v63, %v1798_v31  ;;  %v826_v30 = vcombine.high %v825_v20, %v825_v20  ;;  %v874_v29 = vrot.slane %v867_v22, %v1739_v53  ;;  %v962_v33 = vmul.f32 %v960_v63, %v1802_v35  ;;  %s390_s22 = scalar_lea.vmem [#allocation5], %s1917_s25  ;;  %s1504_s25 = scalar_lea.vmem %s1503_s16, 64 }
  0xe8   : > { %v939_v32 = vcombine.low %v935_v23, %v936_v25  ;;  %v857_v57 = vrot.slane %v850_v26, %v1739_v53  ;;  %v897_v60 = vrot.slane %v890_v59, %v1739_v53  ;;  %v922_v61 = vrot.slane %v915_v27, %v1739_v53  ;;  %s1110_s26 = sshll.u32 %s390_s22, 4  ;;  %s1974_s26 = int_to_ptr.vmem [resolvable:$true] %s1110_s26 }
  0xe9   : > { %v988_v34 = vmul.f32 %v987_v0, %v1779_v21  ;;  %v833_v36 = vrot.slane %v826_v30, %v1739_v53  ;;  %v881_v37 = vrot.slane %v874_v29, %v1739_v53  ;;  %v965_v63 = vcombine.high %v961_v28, %v962_v33  ;;  %s1498_s19 = scalar_lea.vmem %s1974_s26, 32  ;;  %p1505_p0 = scmp.lt.s32.totalorder %s1974_s26, %s1503_s16 }
  0xea   : > { %v946_v38 = vrot.slane %v939_v32, %v1739_v53  ;;  %1378 = vst.msk [vmem:[%s1849_s24 + $0x1] ss:$8 sm:$0x3] %vm1754_vm0, %v857_v57  ;;  %v904_v39 = vrot.slane %v897_v60, %v1739_v53  ;;  %v923_v40 = vcombine.high %v922_v61, %v922_v61  ;;  %v989_v41 = vmul.f32 %v987_v0, %v1782_v24  ;;  %p1499_p11 = scmp.ne.s32.totalorder %s1974_s26, %s1498_s19  ;;  %p1506_p1 = scmp.lt.s32.totalorder %s1504_s25, %s1498_s19 }
  0xeb   : > { %vm1016_vm5 = vcmp.gt.f32.partialorder %v1798_v31, 0.25  ;;  %1377 = vst.msk [vmem:[%s1843_s20 + $0x1] ss:$8 sm:$0x3] %vm1754_vm0, %v833_v36  ;;  %v972_v42 = vrot.slane %v965_v63, %v1739_v53  ;;  %vm1017_vm6 = vcmp.gt.f32.partialorder %v1802_v35, 0.25 }
  0xec   : > { %1379 = vst.msk [vmem:[%s1843_s20 + $0x2] ss:$8 sm:$0x3] %vm1754_vm0, %v881_v37  ;;  %v947_v21 = vcombine.high %v946_v38, %v946_v38  ;;  %v1387_v43 = vsel %vm1016_vm5, 1.0, %v1587_v7  ;;  %v905_v0 = vcombine.high %v904_v39, %v904_v39  ;;  %v930_v24 = vrot.slane %v923_v40, %v1739_v53  ;;  %p1500_p12 = pnand %p1499_p11, %p1674_p4  ;;  %p1507_p2 = por %p1506_p1, %p1505_p0 }
  0xed   : > { %v992_v31 = vcombine.high %v988_v34, %v989_v41  ;;  %v1388_v44 = vsel %vm1017_vm6, 1.0, %v1587_v7  ;;  %v979_v46 = vrot.slane %v972_v42, %v1739_v53 }
  0xee   : > { %v954_v45 = vrot.slane %v947_v21, %v1739_v53  ;;  %v1024_v47 = vcombine.high %v1387_v43, %v1388_v44  ;;  %1380 = vst.msk [vmem:[%s1849_s24 + $0x2] ss:$8 sm:$0x3] %vm1754_vm0, %v905_v0  ;;  %1381 = vst.msk [vmem:[%s1843_s20 + $0x3] ss:$8 sm:$0x3] %vm1754_vm0, %v930_v24  ;;  %p1501_p13 = pneg %p1500_p12 }
  0xef   : > { %v999_v35 = vrot.slane %v992_v31, %v1739_v53  ;;  %1383 = vst.msk [vmem:[%s1843_s20 + $0x4] ss:$8 sm:$0x3] %vm1754_vm0, %v979_v46  ;;  %1384 = vst.msk [vmem:[%s1849_s24 + $0x4] ss:$8 sm:$0x3] %vm1754_vm0, %v979_v46 }
  0xf0   : > { %v955_v48 = vcombine.high %v954_v45, %v954_v45  ;;  %v1031_v7 = vrot.slane %v1024_v47, %v1739_v53  ;;  %p1508_p3 = pnand %p1507_p2, %p1501_p13 }
  0xf1   : > { %v1000_v49 = vcombine.high %v999_v35, %v999_v35 }
  0xf2   : > { %1382 = vst.msk [vmem:[%s1849_s24 + $0x3] ss:$8 sm:$0x3] %vm1754_vm0, %v955_v48  ;;  %v1038_v50 = vrot.slane %v1031_v7, %v1739_v53 }
  0xf3   : > { %v1007_v51 = vrot.slane %v1000_v49, %v1739_v53 }
  0xf4   : > { %1040 = vst.msk [vmem:[%s390_s22] sm:$0x3] %vm1754_vm0, %v1038_v50 }
  0xf5   : > { %v1008_v52 = vcombine.high %v1007_v51, %v1007_v51 }
  0xf6   : > { %1511 = shalt.err (!%p1508_p3)
}
  0xf7   : > { %s1512_s23 = scalar_lea.hbm %s1972_s12, 32  ;;  %s1516_s11 = scalar_lea.hbm %s2038_s8, 64 }
  0xf8   : > { %p1513_p5 = scmp.ne.s32.totalorder %s1972_s12, %s1512_s23  ;;  %p1517_p9 = scmp.lt.u32.totalorder %s1972_s12, %s2038_s8 }
  0xf9   : > { %p1518_p10 = scmp.lt.u32.totalorder %s1516_s11, %s1512_s23  ;;  %p1520_p12 = scmp.lt.u32.totalorder %s1512_s23, %s1972_s12 }
  0xfa   : > { %p1514_p6 = pnand %p1513_p5, %p1674_p4 }
  0xfb   : > { %p1519_p11 = por %p1518_p10, %p1517_p9 }
  0xfc   : > { %p1515_p7 = pneg %p1514_p6 }
  0xfd   : > { %p1521_p13 = por %p1520_p12, %p1519_p11 }
  0xff   : > { %p1522_p0 = pnand %p1521_p13, %p1515_p7 }
 0x101   : > { %1525 = shalt.err (!%p1522_p0)
}
 0x102   : > { %1404 = dma.vmem_to_hbm [thread:$0]  (%p1674_p4), %s1974_s26, 32, %s1972_s12, %s1078_s14   ;;  %1385 = vst.msk [vmem:[%s1843_s20 + $0x5] ss:$8 sm:$0x3] %vm1754_vm0, %v1008_v52 }
 0x103   : > { %1386 = vst.msk [vmem:[%s1849_s24 + $0x5] ss:$8 sm:$0x3] %vm1754_vm0, %v1008_v52 }
 0x104 PF: > { %p1416_p1 = scmp.ge.s32.totalorder %s1580_s10, 2  ;;  %s1170_s19 = sand.u32 1, %s1560_s27  }
 0x105   : > { %s1171_s15 = scalar_lea.sflag [#allocation3], %s1170_s19 }
 0x106   : > { %p1411_p2 = pnand %p1416_p1, %p1681_p8 }
 0x108   : > { %1555 = dma.done.wait (!%p1411_p2), %s1171_s15, 32  }
 0x109   : > { %1557 = vsyncadd (!%p1411_p2), %s1171_s15, 4294967264  ;;  %s23_s10 = sadd.s32 1, %s1580_s10   ;;  %s2047_s27 = smov %s1564_s28 }
 0x10a   : > { %p20_p4 = scmp.ge.s32.totalorder %s23_s10, 4   ;;  %s2048_s28 = smov %s1568_s29 }
 0x10b   : > { %s2049_s29 = smov %s1687_s18  ;;  %s2050_s30 = smov %s1576_s9 }
 0x10c   : > { %s2051_s9 = smov %s2053_s13  ;;  %22 = sbr.rel (!%p20_p4) target bundleno = 7 (0x7), region = 144 }
 0x113   :  { %1176 = vsyncpa [#allocation3], 1 }
 0x114   :  { %1178 = vsyncpa [#allocation3 + $0x1], 1 }
 0x115   :  { %1179 = vsyncpa [#allocation4], 1 }
 0x116   :  { %1181 = vsyncpa [#allocation4 + $0x1], 1 }

</bundles_post_ra>
